<compile_context>
chip_gen: v7x
topology: tpu7x:2x2x1
jax: 0.10.0
libtpu: 0.0.40
codegen_flags: <defaults>
</compile_context>

<pallas_src>
import jax
import jax.numpy as jnp
import numpy as np
from jax.experimental import pallas as pl
from jax.experimental.pallas import tpu as pltpu


def _cdiv(a, b):
    return -(-a // b)


def _round_up(n, m):
    return _cdiv(n, m) * m


# ---------------------------------------------------------------------------
# Kernel factory
# ---------------------------------------------------------------------------
def _make_flora_kernel(*, w_is_batched, has_scales, use_scratch):
    """Tiled matmul(+scales) + ReLU kernel.

    Ref order:
      x_ref  : (1, tm, tk)   compute dtype
      w_ref  : (1, tk, tn) if w_is_batched else (tk, tn)   compute dtype
      [b_ref : (1, 1, tk)    compute dtype -- rank==1 per-batch row scale]
      [a_ref : (1, 1, tn)    float32      -- rank==1 per-batch column scale]
      o_ref  : (1, tm, tn)   out dtype (f32 + doubles as K-resident accumulator
                                        when use_scratch=False)
      [acc_ref: (1, tm, tn)  f32 VMEM scratch when use_scratch=True]
    """

    def kernel(*refs):
        if has_scales:
            x_ref, w_ref, b_ref, a_ref = refs[:4]
            rest = refs[4:]
        else:
            x_ref, w_ref = refs[:2]
            b_ref = a_ref = None
            rest = refs[2:]
        o_ref = rest[0]
        acc_ref = rest[1] if use_scratch else o_ref  # accumulate in-place in f32 output

        k = pl.program_id(3)

        @pl.when(k == 0)
        def _():
            acc_ref[...] = jnp.zeros_like(acc_ref)

        x_tile = x_ref[0]
        if has_scales:
            x_tile = x_tile * b_ref[0]                      # VPU row scale, (1, tk) bcast
        w_tile = w_ref[0] if w_is_batched else w_ref[...]
        acc_ref[0] += jnp.dot(x_tile, w_tile, preferred_element_type=jnp.float32)

        @pl.when(k == pl.num_programs(3) - 1)
        def _():
            res = acc_ref[0]
            if has_scales:
                res = res * a_ref[0].astype(jnp.float32)    # column scale BEFORE ReLU
            o_ref[0] = jnp.maximum(res, 0.0).astype(o_ref.dtype)

    return kernel


# ---------------------------------------------------------------------------
# Per-generation tile targets (tm, tk, tn, vmem_limit_bytes)
# ---------------------------------------------------------------------------
def _chip_tile_targets():
    kind = ""
    try:
        kind = jax.devices()[0].device_kind.lower()
    except Exception:
        pass
    if "v5" in kind:
        # v5e: ridge ~240 FLOP/B, 16 MiB default scoped VMEM -> keep explicit limit.
        return 512, 1024, 512, 32 * 1024 * 1024
    if "v6" in kind:
        # v6e: ridge ~680 FLOP/B, 128 MiB physical VMEM -> largest tiles.
        return 2048, 1024, 1024, 64 * 1024 * 1024
    if "v7" in kind:
        # v7x: ridge ~310 FLOP/B but only 64 MiB VMEM per TC -> cap working set.
        return 1024, 1024, 512, 48 * 1024 * 1024
    return 1024, 1024, 512, 48 * 1024 * 1024


def _pick_tile(n, target, align):
    """Tile <= target, multiple of `align`, minimizing padded extent of n."""
    n_al = _round_up(n, align)
    if n_al <= target:
        return n_al
    best_t, best_pad = align, _round_up(n, align)
    t = align
    while t <= target:
        pad = _round_up(n, t)
        if pad < best_pad or (pad == best_pad and t > best_t):
            best_pad, best_t = pad, t
        t += align
    return best_t


def _shrink_to_budget(tm, tk, tn, m_align, in_item, out_item, use_scratch, budget):
    """Safety net: keep the double-buffered working set inside the scoped-VMEM budget."""

    def usage(a, b, c):
        u = 2 * (a * b + b * c) * in_item + 2 * a * c * out_item
        if use_scratch:
            u += a * c * 4
        return u

    def halve(v, floor, align):
        return max(floor, (v // 2) // align * align)

    while usage(tm, tk, tn) > budget:
        if tm > m_align and tm >= max(tk, tn):
            tm = halve(tm, m_align, m_align)
        elif tk > 128 and tk >= tn:
            tk = halve(tk, 128, 128)
        elif tn > 128:
            tn = halve(tn, 128, 128)
        elif tm > m_align:
            tm = halve(tm, m_align, m_align)
        elif tk > 128:
            tk = halve(tk, 128, 128)
        else:
            break
    return tm, tk, tn


# ---------------------------------------------------------------------------
# Forward wrapper
# ---------------------------------------------------------------------------
def flora_forward(x, adapter_b, adapter_a, W0, rank, *,
                  compute_dtype=jnp.bfloat16, out_dtype=jnp.float32):
    B, S, Din = x.shape
    O = W0.shape[1]
    R = rank
    assert adapter_b.shape == (B, Din, R)
    assert adapter_a.shape == (B, R, O)

    in_item = jnp.dtype(compute_dtype).itemsize
    out_item = jnp.dtype(out_dtype).itemsize
    use_scratch = jnp.dtype(out_dtype) != jnp.dtype(jnp.float32)

    # Single cast of x (drops the fp16 emulation hop: bf16 has fewer mantissa bits than
    # fp16, so the extra rounding adds nothing but inf-saturation; saves HBM passes).
    xc = x.astype(compute_dtype)

    # --- tile selection -----------------------------------------------------
    m_align = 8 if (in_item == 4 and out_item == 4) else 16   # bf16 sublane packing
    tm_t, tk_t, tn_t, vmem_limit = _chip_tile_targets()
    tm = _pick_tile(S, tm_t, m_align)
    tk = _pick_tile(Din, tk_t, 128)
    tn = _pick_tile(O, tn_t, 128)
    tm, tk, tn = _shrink_to_budget(tm, tk, tn, m_align, in_item, out_item,
                                   use_scratch, int(vmem_limit * 0.9))
    # v7x megacore: keep >= 2 parallel (b, i, j) blocks so both TensorCores get work.
    if B * _cdiv(S, tm) * _cdiv(O, tn) < 2:
        if S > m_align and tm >= 2 * m_align:
            tm = max(m_align, _round_up(_cdiv(S, 2), m_align))
        elif O > 128 and tn >= 256:
            tn = max(128, _round_up(_cdiv(O, 2), 128))

    Sp, Dp, Np = _round_up(S, tm), _round_up(Din, tk), _round_up(O, tn)

    if (Sp, Dp) != (S, Din):
        xc = jnp.pad(xc, ((0, 0), (0, Sp - S), (0, Dp - Din)))

    # --- operands / kernel per branch ---------------------------------------
    if R == 1:
        # No per-batch Weff: stream W0 un-batched, scale by b / a inside the kernel.
        w = W0.astype(compute_dtype)
        if (Dp, Np) != (Din, O):
            w = jnp.pad(w, ((0, Dp - Din), (0, Np - O)))
        bscale = adapter_b[:, :, 0][:, None, :].astype(compute_dtype)   # (B, 1, Din)
        if Dp != Din:
            bscale = jnp.pad(bscale, ((0, 0), (0, 0), (0, Dp - Din)))
        ascale = adapter_a[:, 0, :][:, None, :].astype(jnp.float32)     # (B, 1, O)
        if Np != O:
            ascale = jnp.pad(ascale, ((0, 0), (0, 0), (0, Np - O)))

        kernel = _make_flora_kernel(w_is_batched=False, has_scales=True,
                                    use_scratch=use_scratch)
        in_specs = [
            pl.BlockSpec((1, tm, tk), lambda b, i, j, k: (b, i, k)),    # x
            pl.BlockSpec((tk, tn),    lambda b, i, j, k: (k, j)),       # W0 (shared)
            pl.BlockSpec((1, 1, tk),  lambda b, i, j, k: (b, 0, k)),    # row scale b
            pl.BlockSpec((1, 1, tn),  lambda b, i, j, k: (b, 0, j)),    # col scale a
        ]
        operands = (xc, w, bscale, ascale)
        w_bytes_total = Dp * Np * in_item * B                           # streamed per batch
    else:
        assert O == Din, "torch .view(B, S, d_model, rank) requires out_features == d_model"
        # Fused single-pass fold of the adapter tail (incl. the .view scramble + mean):
        #   T[b,k,rho,omega] = adapter_b[b,k,rho] * W0[k,omega]        (broadcast product)
        #   T_view = T.reshape(B, D, D, R)      (flat rho*O+omega == d*R+r', since O == D)
        #   Weff[b,k,d] = (1/R) * sum_r adapter_a[b,r,d] * T_view[b,k,d,r]
        T = adapter_b[:, :, :, None] * W0[None, :, None, :]             # (B, D, R, O)
        T = T.reshape(B, Din, Din, R)
        Weff = (jnp.einsum("brd,bkdr->bkd", adapter_a, T) / R).astype(compute_dtype)
        # TODO(synk): for very large d_model, build Weff in a Pallas prologue kernel to
        # avoid materializing the (B, D, D, R) broadcast product in HBM.
        if (Dp, Np) != (Din, O):
            Weff = jnp.pad(Weff, ((0, 0), (0, Dp - Din), (0, Np - O)))

        kernel = _make_flora_kernel(w_is_batched=True, has_scales=False,
                                    use_scratch=use_scratch)
        in_specs = [
            pl.BlockSpec((1, tm, tk), lambda b, i, j, k: (b, i, k)),    # x
            pl.BlockSpec((1, tk, tn), lambda b, i, j, k: (b, k, j)),    # Weff
        ]
        operands = (xc, Weff)
        w_bytes_total = B * Dp * Np * in_item

    grid = (B, Sp // tm, Np // tn, Dp // tk)
    n_m, n_n = Sp // tm, Np // tn
    scratch = [pltpu.VMEM((1, tm, tn), jnp.float32)] if use_scratch else []

    # Cost estimate with actual re-read factors (x re-read per N tile, W per M tile).
    cost = pl.CostEstimate(
        flops=2 * B * Sp * Dp * Np,
        transcendentals=0,
        bytes_accessed=(B * Sp * Dp * in_item) * n_n
                       + w_bytes_total * n_m
                       + B * Sp * Np * out_item,
    )

    out_padded = pl.pallas_call(
        kernel,
        out_shape=jax.ShapeDtypeStruct((B, Sp, Np), out_dtype),
        grid_spec=pltpu.PrefetchScalarGridSpec(
            num_scalar_prefetch=0,
            grid=grid,
            in_specs=in_specs,
            # NOTE: if bundle dumps show exposed weight-DMA waits along K, add
            # pipeline_mode=pl.Buffered(3) to the weight BlockSpec (VMEM permitting).
            out_specs=pl.BlockSpec((1, tm, tn), lambda b, i, j, k: (b, i, j)),
            scratch_shapes=scratch,
        ),
        compiler_params=pltpu.CompilerParams(
            dimension_semantics=("parallel", "parallel", "parallel", "arbitrary"),
            vmem_limit_bytes=vmem_limit,
        ),
        cost_estimate=cost,
    )(*operands)

    if Sp != S or Np != O:
        return out_padded[:, :S, :O]
    return out_padded


# ---------------------------------------------------------------------------
# Pure-JAX mirror of the PyTorch forward (both branches) for verification.
# ---------------------------------------------------------------------------
def flora_ref(x, adapter_b, adapter_a, W0, rank):
    B, S, D = x.shape
    x16 = x.astype(jnp.float16)
    if rank == 1:
        b = adapter_b[:, :, 0]                                          # (B, D)
        a = adapter_a[:, 0, :]                                          # (B, O)
        Bx = b[:, None, :] * x16                                        # f32
        BxW0 = jnp.einsum("bsd,do->bso", Bx, W0,
                          precision=jax.lax.Precision.HIGHEST)
        return jnp.maximum(a[:, None, :] * BxW0, 0.0)
    bx = adapter_b[:, None, :, :] * x16[..., None]                      # (B, S, D, R) f32
    bx = bx.reshape(B * S, D, rank)
    bxwo = jnp.matmul(jnp.swapaxes(bx, 1, 2), W0[None, :, :],
                      precision=jax.lax.Precision.HIGHEST)              # (B*S, R, O)
    bxwo = bxwo.reshape(B, S, D, rank)                                  # torch .view (O == D)
    a_t = jnp.transpose(adapter_a, (0, 2, 1))[:, None, :, :]            # (B, 1, O, R)
    out = jnp.mean(a_t * bxwo, axis=-1)
    return jnp.maximum(out, 0.0)


if __name__ == "__main__":
    B, S, D, R = 2, 8, 32, 4            # batch, seq_length, d_model (= out_features), rank
    O = D

    key = jax.random.PRNGKey(0)
    kx, kb, ka, kw = jax.random.split(key, 4)
    x = jax.random.normal(kx, (B, S, D), jnp.float32)
    adapter_b = jax.random.normal(kb, (B, D, R), jnp.float32)
    adapter_a = jax.random.normal(ka, (B, R, O), jnp.float32)
    W0 = jax.random.normal(kw, (D, O), jnp.float32)

    ref = flora_ref(x, adapter_b, adapter_a, W0, R)

    # bf16 matmul error grows ~sqrt(D)*eps_bf16; tolerance chosen for D=32 and scaled
    # with sqrt(D) so the check stays meaningful at larger d_model.
    tol_bf16 = float(0.1 * np.sqrt(D / 32.0))

    # 1) rank>1, f32 compute / f32 out: verifies the fused Weff fold + kernel algebra.
    out_f32 = jax.block_until_ready(
        flora_forward(x, adapter_b, adapter_a, W0, R, compute_dtype=jnp.float32))
    np.testing.assert_allclose(np.asarray(out_f32), np.asarray(ref), rtol=2e-2, atol=2e-2)

    # 2) rank>1, default perf path: bf16 MXU operands, f32 out (acc-in-output, no scratch).
    out_bf = jax.block_until_ready(flora_forward(x, adapter_b, adapter_a, W0, R))
    np.testing.assert_allclose(np.asarray(out_bf), np.asarray(ref),
                               rtol=tol_bf16, atol=tol_bf16)

    # 3) rank>1, bf16 output path (halved writeback; f32 VMEM scratch accumulator).
    out_bf16o = jax.block_until_ready(
        flora_forward(x, adapter_b, adapter_a, W0, R, out_dtype=jnp.bfloat16))
    np.testing.assert_allclose(np.asarray(out_bf16o.astype(jnp.float32)), np.asarray(ref),
                               rtol=tol_bf16, atol=tol_bf16)

    # 4) rank == 1 branch (no Weff materialization; scales fused in-kernel).
    kb1, ka1 = jax.random.split(jax.random.PRNGKey(1), 2)
    b1 = jax.random.normal(kb1, (B, D, 1), jnp.float32)
    a1 = jax.random.normal(ka1, (B, 1, O), jnp.float32)
    ref1 = flora_ref(x, b1, a1, W0, 1)
    out1_f32 = jax.block_until_ready(
        flora_forward(x, b1, a1, W0, 1, compute_dtype=jnp.float32))
    np.testing.assert_allclose(np.asarray(out1_f32), np.asarray(ref1), rtol=2e-2, atol=2e-2)
    out1_bf = jax.block_until_ready(flora_forward(x, b1, a1, W0, 1))
    np.testing.assert_allclose(np.asarray(out1_bf), np.asarray(ref1),
                               rtol=tol_bf16, atol=tol_bf16)

    print("KERNEL_OK")
</pallas_src>

<mosaic_0001>
module attributes {stable_mosaic.version = 11 : i64} {
  func.func @kernel(%arg0: i32, %arg1: i32, %arg2: i32, %arg3: i32, %arg4: memref<1x8x128xf32, #tpu.memory_space<vmem>>, %arg5: memref<1x128x128xf32, #tpu.memory_space<vmem>>, %arg6: memref<1x8x128xf32, #tpu.memory_space<vmem>>) attributes {dimension_semantics = [#tpu.dimension_semantics<parallel>, #tpu.dimension_semantics<parallel>, #tpu.dimension_semantics<parallel>, #tpu.dimension_semantics<arbitrary>], iteration_bounds = array<i64: 2, 1, 1, 1>, scalar_prefetch = 0 : i64, scratch_operands = 0 : i64, tpu.core_type = #tpu.core_type<tc>, window_params = [{transform_indices = @transform_0, window_bounds = array<i64: 1, 8, 128>}, {transform_indices = @transform_1, window_bounds = array<i64: 1, 128, 128>}, {transform_indices = @transform_2, window_bounds = array<i64: 1, 8, 128>}]} {
    %c0_i32 = arith.constant 0 : i32
    %0 = arith.cmpi eq, %arg3, %c0_i32 : i32
    %1 = arith.extui %0 : i1 to i32
    %c0_i32_0 = arith.constant 0 : i32
    %2 = arith.cmpi ne, %1, %c0_i32_0 : i32
    scf.if %2 {
      %cst_14 = arith.constant 0.000000e+00 : f32
      %17 = vector.broadcast %cst_14 : f32 to vector<1x8x128xf32>
      %c0_15 = arith.constant 0 : index
      %c0_16 = arith.constant 0 : index
      %c0_17 = arith.constant 0 : index
      %18 = vector.load %arg6[%c0_15, %c0_16, %c0_17] : memref<1x8x128xf32, #tpu.memory_space<vmem>>, vector<1x8x128xf32>
      tpu.vector_store %arg6[%c0_15, %c0_16, %c0_17], %17 {strides = array<i32>} : memref<1x8x128xf32, #tpu.memory_space<vmem>>, vector<1x8x128xf32>,
    } else {
    }
    %c0 = arith.constant 0 : index
    %c0_1 = arith.constant 0 : index
    %c0_2 = arith.constant 0 : index
    %3 = vector.load %arg4[%c0, %c0_1, %c0_2] : memref<1x8x128xf32, #tpu.memory_space<vmem>>, vector<1x8x128xf32>
    %4 = vector.shape_cast %3 : vector<1x8x128xf32> to vector<8x128xf32>
    %c0_3 = arith.constant 0 : index
    %c0_4 = arith.constant 0 : index
    %c0_5 = arith.constant 0 : index
    %5 = vector.load %arg5[%c0_3, %c0_4, %c0_5] : memref<1x128x128xf32, #tpu.memory_space<vmem>>, vector<1x128x128xf32>
    %6 = vector.shape_cast %5 : vector<1x128x128xf32> to vector<128x128xf32>
    %c0_6 = arith.constant 0 : index
    %c0_7 = arith.constant 0 : index
    %c0_8 = arith.constant 0 : index
    %7 = vector.load %arg6[%c0_6, %c0_7, %c0_8] : memref<1x8x128xf32, #tpu.memory_space<vmem>>, vector<1x8x128xf32>
    %8 = vector.shape_cast %7 : vector<1x8x128xf32> to vector<8x128xf32>
    %cst = arith.constant dense<0.000000e+00> : vector<8x128xf32>
    %9 = tpu.matmul %4, %6, %cst {dimension_numbers = #tpu.dot_dimension_numbers<[1], [0], [0], [1], [0, 0, 1, 1], [], []>} : vector<8x128xf32>, vector<128x128xf32>, vector<8x128xf32> -> vector<8x128xf32>
    %10 = arith.addf %8, %9 : vector<8x128xf32>
    %c0_9 = arith.constant 0 : index
    %c0_10 = arith.constant 0 : index
    %c0_11 = arith.constant 0 : index
    %11 = vector.load %arg6[%c0_9, %c0_10, %c0_11] : memref<1x8x128xf32, #tpu.memory_space<vmem>>, vector<1x8x128xf32>
    %12 = vector.shape_cast %11 : vector<1x8x128xf32> to vector<8x128xf32>
    %13 = vector.shape_cast %10 : vector<8x128xf32> to vector<1x8x128xf32>
    tpu.vector_store %arg6[%c0_9, %c0_10, %c0_11], %13 {strides = array<i32>} : memref<1x8x128xf32, #tpu.memory_space<vmem>>, vector<1x8x128xf32>,
    %c0_i32_12 = arith.constant 0 : i32
    %14 = arith.cmpi eq, %arg3, %c0_i32_12 : i32
    %15 = arith.extui %14 : i1 to i32
    %c0_i32_13 = arith.constant 0 : i32
    %16 = arith.cmpi ne, %15, %c0_i32_13 : i32
    scf.if %16 {
      %c0_14 = arith.constant 0 : index
      %c0_15 = arith.constant 0 : index
      %c0_16 = arith.constant 0 : index
      %17 = vector.load %arg6[%c0_14, %c0_15, %c0_16] : memref<1x8x128xf32, #tpu.memory_space<vmem>>, vector<1x8x128xf32>
      %18 = vector.shape_cast %17 : vector<1x8x128xf32> to vector<8x128xf32>
      %cst_17 = arith.constant 0.000000e+00 : f32
      %19 = vector.broadcast %cst_17 : f32 to vector<8x128xf32>
      %20 = arith.maximumf %18, %19 : vector<8x128xf32>
      %c0_18 = arith.constant 0 : index
      %c0_19 = arith.constant 0 : index
      %c0_20 = arith.constant 0 : index
      %21 = vector.load %arg6[%c0_18, %c0_19, %c0_20] : memref<1x8x128xf32, #tpu.memory_space<vmem>>, vector<1x8x128xf32>
      %22 = vector.shape_cast %21 : vector<1x8x128xf32> to vector<8x128xf32>
      %23 = vector.shape_cast %20 : vector<8x128xf32> to vector<1x8x128xf32>
      tpu.vector_store %arg6[%c0_18, %c0_19, %c0_20], %23 {strides = array<i32>} : memref<1x8x128xf32, #tpu.memory_space<vmem>>, vector<1x8x128xf32>,
    } else {
    }
    return
  }
  func.func @transform_0(%arg0: i32, %arg1: i32, %arg2: i32, %arg3: i32) -> (i32, i32, i32) {
    %c0_i32 = arith.constant 0 : i32
    return %arg0, %arg1, %arg3 : i32, i32, i32
  }
  func.func @transform_1(%arg0: i32, %arg1: i32, %arg2: i32, %arg3: i32) -> (i32, i32, i32) {
    %c0_i32 = arith.constant 0 : i32
    return %arg0, %arg3, %arg2 : i32, i32, i32
  }
  func.func @transform_2(%arg0: i32, %arg1: i32, %arg2: i32, %arg3: i32) -> (i32, i32, i32) {
    %c0_i32 = arith.constant 0 : i32
    return %arg0, %arg1, %arg2 : i32, i32, i32
  }
}

</mosaic_0001>

<bundles_post_ra>
// kernel: tpu_custom_call.1
= control target key start
LH: loop header
LB: loop body
LE: loop exit
PB: predicated region body
PF: predicated region fallthrough
CT: control target
= control target key end

     0   :  { %7 = vsyncpa [#allocation3], 0  ;;  %s1060_s0 = inlined_call_operand.hbm [shape: f32[2,8,128], index: 0, kind: input, shape index: {}]   ;;  %s1061_s1 = inlined_call_operand.hbm [shape: f32[2,128,128], index: 1, kind: input, shape index: {}]   ;;  %s1062_s2 = inlined_call_operand.hbm [shape: f32[2,8,128], index: 2, kind: output, shape index: {}]  }
   0x1   :  { %9 = vsyncpa [#allocation3 + $0x1], 0 }
   0x2   :  { %10 = vsyncpa [#allocation6], 0 }
   0x3   :  { %12 = vsyncpa [#allocation6 + $0x1], 0 }
   0x4   :  { %13 = vsyncpa [#allocation4], 0 }
   0x5   :  { %15 = vsyncpa [#allocation4 + $0x1], 0  ;;  %s812_s9 = smov 0   ;;  %s814_s10 = smov 0  }
   0x6   :  { %s816_s11 = smov 0   ;;  %s818_s12 = smov 0  }
   0x7   :  { %s820_s13 = smov 0   ;;  %s822_s14 = smov 0  }
   0x8 LB: > { %s475_s15 = sadd.s32 4294967295, %s787_s14   ;;  %s476_s16 = sadd.s32 4294967294, %s787_s14   ;;  %s787_s14 = sphi %s822_s14, %s21_s14   ;;  %s783_s13 = sphi %s820_s13, %s1081_s13   ;;  %s779_s12 = sphi %s818_s12, %s1080_s12   ;;  %s775_s11 = sphi %s816_s11, %s1079_s11   ;;  %s771_s10 = sphi %s814_s10, %s1078_s10   ;;  %s767_s9 = sphi %s812_s9, %s1077_s9  }
   0x9   : > { %s47_s17 = sadd.s32 1, %s783_s13  ;;  %s58_s18 = sadd.s32 1, %s775_s11 }
   0xa   : > { %p49_p0 = scmp.ge.s32.totalorder %s47_s17, 2  ;;  %p65_p1 = scmp.ne.s32.totalorder %s775_s11, %s771_s10 }
   0xb   : > { %p66_p2 = scmp.eq.s32.totalorder %s787_s14, 0  ;;  %p71_p3 = scmp.ne.s32.totalorder %s771_s10, %s767_s9 }
   0xc   : > { %s1083_s17 = smov (%p49_p0, %s47_s17), 0  ;;  %p72_p5 = scmp.eq.s32.totalorder %s475_s15, 0 }
   0xd   : > { %p853_p4 = por %p66_p2, %p65_p1  ;;  %s51_s20 = ssub.s32 %s783_s13, %s1083_s17 }
   0xe   : > { %p129_p6 = scmp.eq.s32.totalorder %s475_s15, 1  ;;  %p56_p7 = scmp.eq.s32.totalorder %s51_s20, 0 }
   0xf   : > { %p859_p8 = por %p72_p5, %p71_p3  ;;  %p135_p10 = scmp.eq.s32.totalorder %s476_s16, 1 }
  0x10   : > { %p863_p9 = por %p129_p6, %p65_p1  ;;  %p586_p13 = scmp.lt.s32.totalorder %s787_s14, 2 }
  0x11   : > { %s1066_s21 = scalar_select %p859_p8, 1, 0 }
  0x12   : > { %s1067_s22 = scalar_select %p863_p9, 1, 0 }
  0x13   : > { %s868_s23 = scalar_select %p56_p7, %s775_s11, %s58_s18  }
  0x14   : > { %p870_p11 = por %p135_p10, %p71_p3  ;;  %s877_s25 = sand.u32 1, %s775_s11  }
  0x15   : > { %s479_s26 = sshll.u32 %s877_s25, 3  ;;  %s480_s27 = sshll.u32 %s783_s13, 7 }
  0x16   : > { %s1068_s24 = scalar_select %p870_p11, 1, 0 }
  0x17   : > { %s884_s30 = scalar_lea.hbm %s1060_s0, %s480_s27  ;;  %s159_s3 = scalar_lea.vmem [#allocation2], %s479_s26 }
  0x18   : > { %s168_s4 = sshll.u32 %s159_s3, 4  ;;  %p890_p0 = pnand %p586_p13, %p853_p4  ;;  %s886_s4 = int_to_ptr.vmem [resolvable:$true] %s168_s4 }
  0x19   : > { %s156_s6 = scalar_lea.sflag [#allocation3], %s877_s25  ;;  %s641_s7 = scalar_lea.hbm %s884_s30, 128 }
  0x1a   : > { %p642_p3 = scmp.ne.s32.totalorder %s884_s30, %s641_s7  ;;  %p643_p5 = pneg %p890_p0 }
  0x1b   : > { %s646_s16 = scalar_lea.hbm %s1060_s0, 256  ;;  %p647_p4 = scmp.lt.u32.totalorder %s884_s30, %s1060_s0 }
  0x1c   : > { %p644_p6 = pnand %p643_p5, %p642_p3  ;;  %p648_p10 = scmp.lt.u32.totalorder %s646_s16, %s641_s7 }
  0x1d   : > { %p650_p12 = scmp.lt.u32.totalorder %s641_s7, %s884_s30 }
  0x1e   : > { %p645_p7 = pneg %p644_p6  ;;  %p649_p13 = por %p648_p10, %p647_p4 }
  0x20   : > { %p651_p1 = por %p650_p12, %p649_p13 }
  0x22   : > { %p652_p2 = pnand %p651_p1, %p645_p7 }
  0x24   : > { %655 = shalt.err (!%p652_p2)
}
  0x25   : > { %s656_s20 = scalar_lea.vmem %s886_s4, 128  ;;  %s789_s26 = smov [#allocation2]  }
  0x26   : > { %p657_p3 = scmp.ne.s32.totalorder %s886_s4, %s656_s20  ;;  %s661_s27 = sshll.u32 %s789_s26, 4  ;;  %s662_s27 = int_to_ptr.vmem [resolvable:$false] %s661_s27 }
  0x27   : > { %s663_s28 = scalar_lea.vmem %s662_s27, 256  ;;  %p664_p9 = scmp.lt.s32.totalorder %s886_s4, %s662_s27 }
  0x28   : > { %p659_p6 = pnand %p657_p3, %p643_p5  ;;  %p665_p4 = scmp.lt.s32.totalorder %s663_s28, %s656_s20 }
  0x2a   : > { %p660_p11 = pneg %p659_p6  ;;  %p666_p10 = por %p665_p4, %p664_p9 }
  0x2c   : > { %p667_p12 = pnand %p666_p10, %p660_p11 }
  0x2e   : > { %670 = shalt.err (!%p667_p12)
}
  0x2f   : > { %578 = dma.hbm_to_vmem [thread:$0]  (!%p890_p0), %s884_s30, 128, %s886_s4, %s156_s6  }
  0x30   : > { %p1070_p1 = scmp.lt.s32.totalorder %s787_s14, 3  ;;  %p1071_p2 = scmp.ge.s32.totalorder %s787_s14, 1 }
  0x31   : > { %s481_s3 = sshll.u32 %s877_s25, 7  ;;  %s492_s7 = sshll.u32 %s783_s13, 11 }
  0x32   : > { %p926_p7 = pnand %p1071_p2, %p1070_p1  ;;  %s935_s16 = scalar_lea.hbm %s1061_s1, %s492_s7 }
  0x33   : > { %s179_s18 = scalar_lea.vmem [#allocation5], %s481_s3  ;;  %s176_s30 = scalar_lea.sflag [#allocation6], %s877_s25 }
  0x34   : > { %s189_s19 = sshll.u32 %s179_s18, 4  ;;  %s671_s4 = scalar_lea.hbm %s935_s16, 2048  ;;  %s937_s19 = int_to_ptr.vmem [resolvable:$true] %s189_s19 }
  0x35   : > { %p672_p9 = scmp.ne.s32.totalorder %s935_s16, %s671_s4  ;;  %s676_s26 = scalar_lea.hbm %s1061_s1, 4096 }
  0x36   : > { %p677_p3 = scmp.lt.u32.totalorder %s935_s16, %s1061_s1  ;;  %p678_p6 = scmp.lt.u32.totalorder %s676_s26, %s671_s4 }
  0x37   : > { %p674_p11 = pnand %p672_p9, %p643_p5  ;;  %p680_p10 = scmp.lt.u32.totalorder %s671_s4, %s935_s16 }
  0x38   : > { %p679_p4 = por %p678_p6, %p677_p3 }
  0x39   : > { %p675_p13 = pneg %p674_p11 }
  0x3a   : > { %p681_p12 = por %p680_p10, %p679_p4 }
  0x3c   : > { %p682_p1 = pnand %p681_p12, %p675_p13 }
  0x3e   : > { %685 = shalt.err (!%p682_p1)
}
  0x3f   : > { %s686_s3 = scalar_lea.vmem %s937_s19, 2048  ;;  %s790_s7 = smov [#allocation5]  }
  0x40   : > { %p687_p2 = scmp.ne.s32.totalorder %s937_s19, %s686_s3  ;;  %s691_s8 = sshll.u32 %s790_s7, 4  ;;  %s692_s8 = int_to_ptr.vmem [resolvable:$false] %s691_s8 }
  0x41   : > { %s693_s15 = scalar_lea.vmem %s692_s8, 4096  ;;  %p694_p8 = scmp.lt.s32.totalorder %s937_s19, %s692_s8 }
  0x42   : > { %p689_p9 = pnand %p687_p2, %p643_p5  ;;  %p695_p3 = scmp.lt.s32.totalorder %s693_s15, %s686_s3 }
  0x44   : > { %p690_p11 = pneg %p689_p9  ;;  %p696_p6 = por %p695_p3, %p694_p8 }
  0x46   : > { %p697_p4 = pnand %p696_p6, %p690_p11 }
  0x48   : > { %700 = shalt.err (!%p697_p4)
}
  0x49   : > { %s791_s18 = smov 128   ;;  %s792_s4 = smov 8  }
  0x4a   : > { %581 = dma.hbm_to_vmem [thread:$0]  (!%p890_p0), %s935_s16, 2048, %s937_s19, %s176_s30, %s791_s18, %s791_s18, %s792_s4  }
  0x4b   : > { %201 = sbr.rel (%p926_p7) target bundleno = 348 (0x15c), region = 28  ;;  %s968_s6 = sand.u32 (!%p926_p7), 1, %s771_s10  }
  0x4c   : > { %s485_s20 = sshll.u32 (!%p926_p7), %s968_s6, 3  ;;  %s204_s26 = scalar_lea.sflag (!%p926_p7), [#allocation3], %s968_s6 }
  0x4d   : > { %s974_s27 = scalar_lea.vmem (!%p926_p7), [#allocation2], %s485_s20  ;;  %p1073_p8 = scmp.ne.s32.totalorder (!%p926_p7), %s1066_s21, 0 }
  0x52   : > { %754 = dma.done.wait (%p1073_p8), %s204_s26, 128  }
  0x53   : > { %756 = vsyncadd (%p1073_p8), %s204_s26, 4294967168  ;;  %s486_s25 = sshll.u32 %s968_s6, 7  ;;  %s213_s5 = scalar_lea.sflag [#allocation6], %s968_s6 }
  0x54   : > { %s982_s29 = scalar_lea.vmem [#allocation5], %s486_s25 }
  0x55   : > { %758 = dma.done.wait (%p1073_p8), %s213_s5, 2048  }
  0x56   : > { %760 = vsyncadd (%p1073_p8), %s213_s5, 4294965248  ;;  %v793_v0 = vmov 0.0|0.0   ;;  %vm794_vm0 = vmmov 0   ;;  %v795_v1 = vmov 0.0   ;;  %v249_v2 = vld [vmem:[%s982_s29] sm:$0xff]  ;;  %v250_v3 = vld [vmem:[%s982_s29 + $0x8] sm:$0xff] }
  0x57   : > { %545 = vmatprep.subr.bf16.mxu0 %v793_v0  ;;  %542 = vmatprep.mubr.msk.f32.mxu0 %vm794_vm0, %v795_v1  ;;  %v251_v4 = vld [vmem:[%s982_s29 + $0x10] sm:$0xff]  ;;  %v546_v5 = vpack.c.bf16 %v250_v3, %v249_v2  ;;  %v252_v6 = vld [vmem:[%s982_s29 + $0x18] sm:$0xff]  ;;  %v253_v8 = vld [vmem:[%s982_s29 + $0x20] sm:$0xff]  ;;  %s489_s21 = sshll.u32 %s779_s12, 7  ;;  %s241_s16 = scalar_lea.vmem [#allocation7], %s485_s20 }
  0x58   : > { %v549_v7 = vpack.c.bf16 %v252_v6, %v251_v4  ;;  %v254_v9 = vld [vmem:[%s982_s29 + $0x28] sm:$0xff]  ;;  %v255_v11 = vld [vmem:[%s982_s29 + $0x30] sm:$0xff]  ;;  %v256_v12 = vld [vmem:[%s982_s29 + $0x38] sm:$0xff]  ;;  %s360_s19 = sshll.u32 %s241_s16, 4  ;;  %s1011_s3 = scalar_lea.hbm %s1062_s2, %s489_s21  ;;  %s1013_s19 = int_to_ptr.vmem [resolvable:$true] %s360_s19 }
  0x59   : > { %547 = vmatpush3.bf16.msra.mxu0 %v546_v5  ;;  %v552_v10 = vpack.c.bf16 %v254_v9, %v253_v8  ;;  %v555_v13 = vpack.c.bf16 %v256_v12, %v255_v11  ;;  %v257_v14 = vld [vmem:[%s982_s29 + $0x40] sm:$0xff]  ;;  %v258_v15 = vld [vmem:[%s982_s29 + $0x48] sm:$0xff]  ;;  %v259_v17 = vld [vmem:[%s982_s29 + $0x50] sm:$0xff]  ;;  %s345_s7 = scalar_lea.sflag [#allocation4], %s968_s6  ;;  %s701_s8 = scalar_lea.vmem %s1013_s19, 128 }
  0x5a   : > { %548 = vmatprep.subr.bf16.mxu0 %v793_v0  ;;  %v558_v16 = vpack.c.bf16 %v258_v15, %v257_v14  ;;  %v260_v18 = vld [vmem:[%s982_s29 + $0x58] sm:$0xff]  ;;  %v261_v20 = vld [vmem:[%s982_s29 + $0x60] sm:$0xff]  ;;  %v262_v21 = vld [vmem:[%s982_s29 + $0x68] sm:$0xff]  ;;  %p702_p0 = scmp.ne.s32.totalorder %s1013_s19, %s701_s8  ;;  %p1074_p5 = scmp.ne.s32.totalorder %s1067_s22, 0 }
  0x5b   : > { %v561_v19 = vpack.c.bf16 %v260_v18, %v259_v17  ;;  %v564_v22 = vpack.c.bf16 %v262_v21, %v261_v20  ;;  %v263_v23 = vld [vmem:[%s982_s29 + $0x70] sm:$0xff]  ;;  %v264_v24 = vld [vmem:[%s982_s29 + $0x78] sm:$0xff]  ;;  %s796_s12 = smov [#allocation7]  }
  0x5c   : > { %v567_v25 = vpack.c.bf16 %v264_v24, %v263_v23  ;;  %v248_v26 = vld [vmem:[%s974_s27] sm:$0xff]  ;;  %p703_p7 = pnand %p702_p0, %p1074_p5  ;;  %s705_s15 = sshll.u32 %s796_s12, 4  ;;  %s706_s15 = int_to_ptr.vmem [resolvable:$false] %s705_s15 }
  0x5d   : > { %550 = vmatpush3.bf16.msra.mxu0 %v549_v7  ;;  %s707_s18 = scalar_lea.vmem %s706_s15, 256  ;;  %p708_p10 = scmp.lt.s32.totalorder %s1013_s19, %s706_s15 }
  0x5e   : > { %551 = vmatprep.subr.bf16.mxu0 %v793_v0  ;;  %p704_p13 = pneg %p703_p7  ;;  %p709_p12 = scmp.lt.s32.totalorder %s707_s18, %s701_s8 }
  0x60   : > { %p710_p1 = por %p709_p12, %p708_p10 }
  0x61   : > { %553 = vmatpush3.bf16.msra.mxu0 %v552_v10 }
  0x62   : > { %554 = vmatprep.subr.bf16.mxu0 %v793_v0  ;;  %p711_p2 = pnand %p710_p1, %p704_p13 }
  0x65   : > { %556 = vmatpush3.bf16.msra.mxu0 %v555_v13 }
  0x66   : > { %557 = vmatprep.subr.bf16.mxu0 %v793_v0 }
  0x69   : > { %559 = vmatpush3.bf16.msra.mxu0 %v558_v16 }
  0x6a   : > { %560 = vmatprep.subr.bf16.mxu0 %v793_v0 }
  0x6d   : > { %562 = vmatpush3.bf16.msra.mxu0 %v561_v19 }
  0x6e   : > { %563 = vmatprep.subr.bf16.mxu0 %v793_v0 }
  0x71   : > { %565 = vmatpush3.bf16.msra.mxu0 %v564_v22 }
  0x72   : > { %566 = vmatprep.subr.bf16.mxu0 %v793_v0 }
  0x75   : > { %568 = vmatpush3.bf16.msra.mxu0 %v567_v25 }
  0x78   : > { %543 = vmatmul.mubr.f32.vlgmr.msra.gmra.mrb[0].mxu0 %v248_v26 }
 0x14b   : > { %v332_v27 = vpop.f32.mrb[0].mxu0 }
 0x14c   : > { %v544_v28 = vpop.f32.mrb[1].mxu0  ;;  %v342_v29 = vmax.f32 %v332_v27, 0.0 }
 0x14e   : > { %343 = vst [vmem:[%s241_s16] sm:$0xff] %v342_v29 }
 0x14f   : > { %714 = shalt.err (!%p711_p2)
}
 0x150   : > { %s715_s4 = scalar_lea.hbm %s1011_s3, 128  ;;  %s719_s26 = scalar_lea.hbm %s1062_s2, 256 }
 0x151   : > { %p716_p9 = scmp.ne.s32.totalorder %s1011_s3, %s715_s4  ;;  %p720_p6 = scmp.lt.u32.totalorder %s1011_s3, %s1062_s2 }
 0x152   : > { %p721_p4 = scmp.lt.u32.totalorder %s719_s26, %s715_s4  ;;  %p723_p0 = scmp.lt.u32.totalorder %s715_s4, %s1011_s3 }
 0x153   : > { %p717_p11 = pnand %p716_p9, %p1074_p5 }
 0x154   : > { %p722_p8 = por %p721_p4, %p720_p6 }
 0x155   : > { %p718_p3 = pneg %p717_p11 }
 0x156   : > { %p724_p7 = por %p723_p0, %p722_p8 }
 0x158   : > { %p725_p13 = pnand %p724_p7, %p718_p3 }
 0x15a   : > { %728 = shalt.err (!%p725_p13)
}
 0x15b   : > { %573 = dma.vmem_to_hbm [thread:$0]  (%p1074_p5), %s1013_s19, 128, %s1011_s3, %s345_s7  }
 0x15c PF: > { %s372_s5 = sand.u32 1, %s767_s9   ;;  %p1075_p10 = scmp.ne.s32.totalorder %s1068_s24, 0 }
 0x15d   : > { %p1076_p12 = scmp.ge.s32.totalorder %s787_s14, 2  ;;  %s373_s29 = scalar_lea.sflag [#allocation4], %s372_s5 }
 0x15f   : > { %p583_p1 = pnand %p1076_p12, %p1075_p10 }
 0x161   : > { %762 = dma.done.wait (!%p583_p1), %s373_s29, 128  }
 0x162   : > { %764 = vsyncadd (!%p583_p1), %s373_s29, 4294967168  ;;  %s21_s14 = sadd.s32 1, %s787_s14   ;;  %s1077_s9 = smov %s771_s10 }
 0x163   : > { %p18_p2 = scmp.ge.s32.totalorder %s21_s14, 4   ;;  %s1078_s10 = smov %s775_s11 }
 0x164   : > { %s1079_s11 = smov %s868_s23  ;;  %s1080_s12 = smov %s783_s13 }
 0x165   : > { %s1081_s13 = smov %s1083_s17  ;;  %20 = sbr.rel (!%p18_p2) target bundleno = 8 (0x8), region = 94 }
 0x16c   :  { %378 = vsyncpa [#allocation3], 1 }
 0x16d   :  { %380 = vsyncpa [#allocation3 + $0x1], 1 }
 0x16e   :  { %381 = vsyncpa [#allocation6], 1 }
 0x16f   :  { %383 = vsyncpa [#allocation6 + $0x1], 1 }
 0x170   :  { %384 = vsyncpa [#allocation4], 1 }
 0x171   :  { %386 = vsyncpa [#allocation4 + $0x1], 1 }

</bundles_post_ra>
